<compile_context>
chip_gen: v7x
topology: tpu7x:2x2x1
jax: 0.10.0
libtpu: 0.0.40
codegen_flags: <defaults>
</compile_context>

<pallas_src>
import functools

import jax
import jax.numpy as jnp
from jax import lax
from jax.experimental import pallas as pl
from jax.experimental.pallas import tpu as pltpu

LN_EPS = 1e-5          # PyTorch nn.LayerNorm default
_SLACK = 2 << 20       # VMEM slack reserved for Mosaic-internal scratch


def _round_up(a, b):
    return ((a + b - 1) // b) * b


def _vmem_budget_bytes():
    """Usable VMEM budget: ~85% of physical capacity (headroom for compiler scratch),
    with a conservative fallback if the hardware query is unavailable."""
    try:
        cap = int(pltpu.get_tpu_info().vmem_capacity_bytes)
    except Exception:
        cap = 64 << 20                       # conservative: v7x per-TC size
    return max(16 << 20, min(int(cap * 0.85), cap - (8 << 20)))


def _layernorm(h, gamma, beta):
    mean = jnp.mean(h, axis=-1, keepdims=True)
    centered = h - mean
    var = jnp.mean(centered * centered, axis=-1, keepdims=True)
    return centered * lax.rsqrt(var + LN_EPS) * gamma + beta


# ----------------------------------------------------------------------------- kernels
def _resblock_kernel_fulld(x_ref, w1_ref, w2_ref, vec_ref, o_ref, *, mxu_dtype):
    """Full-D weights resident in VMEM; one grid axis over row tiles."""
    x = x_ref[...].astype(jnp.float32)                  # (tm, D), kept for the residual
    v = vec_ref[...]                                    # (8, D) packed f32 vectors
    b1, g1, be1 = v[0:1], v[1:2], v[2:3]
    b2, g2, be2 = v[3:4], v[4:5], v[5:6]

    # Linear 1 (weights pre-transposed to (in, out) in the wrapper -> plain matmul).
    h = jnp.dot(x.astype(mxu_dtype), w1_ref[...],
                preferred_element_type=jnp.float32) + b1
    h = _layernorm(h, g1, be1)
    h = jnp.maximum(h, 0.0)
    # Dropout: identity in eval mode.
    # TODO(synk): training-mode dropout via pltpu.prng_seed / prng_random_bits.

    # Linear 2
    h = jnp.dot(h.astype(mxu_dtype), w2_ref[...],
                preferred_element_type=jnp.float32) + b2
    h = _layernorm(h, g2, be2)
    o_ref[...] = (x + h).astype(o_ref.dtype)


def _resblock_kernel_tiled(x_ref, w1_ref, w2_ref, vt_ref, vf_ref, o_ref,
                           h_scr, acc, stat_m, stat_i, *, nk, tk, dim, mxu_dtype):
    """Weight-tiled path for large D (weights do not fit VMEM, e.g. v7x).

    Grid axis 1 has 2*nk steps:
      phase 0 (s in [0, nk)) : h1 column block s = x @ W1t[:, block s] + b1, stored in
                               h_scr; LayerNorm-1 statistics accumulated streaming.
      phase 1 (s in [nk,2nk)): apply LN1 + ReLU per block, accumulate Linear-2.
      last step              : bias-2, LayerNorm-2, residual add, write output.
    """
    s = pl.program_id(1)

    @pl.when(s == 0)
    def _():
        stat_m[...] = jnp.zeros_like(stat_m)            # running sum(h1)
        stat_i[...] = jnp.zeros_like(stat_i)            # running sum(h1^2)

    @pl.when(s < nk)
    def _():
        x_mx = x_ref[...].astype(mxu_dtype)
        b1_blk = vt_ref[0:1]                            # (1, tk) slice of bias-1
        hb = jnp.dot(x_mx, w1_ref[...],
                     preferred_element_type=jnp.float32) + b1_blk
        h_scr[s] = hb
        stat_m[...] += jnp.sum(hb, axis=-1, keepdims=True)
        stat_i[...] += jnp.sum(hb * hb, axis=-1, keepdims=True)

    @pl.when(s == nk)
    def _():
        mean = stat_m[...] * (1.0 / dim)
        var = jnp.maximum(stat_i[...] * (1.0 / dim) - mean * mean, 0.0)
        stat_m[...] = mean                              # reuse: now holds LN1 mean
        stat_i[...] = lax.rsqrt(var + LN_EPS)           # reuse: now holds LN1 inv-std
        acc[...] = jnp.zeros_like(acc)

    @pl.when(s >= nk)
    def _():
        k = s - nk
        g1_blk, be1_blk = vt_ref[1:2], vt_ref[2:3]      # (1, tk) slices of gamma1/beta1
        hk = (h_scr[k] - stat_m[...]) * stat_i[...] * g1_blk + be1_blk
        hk = jnp.maximum(hk, 0.0)
        # TODO(synk): training-mode dropout would mask hk here.
        acc[...] += jnp.dot(hk.astype(mxu_dtype), w2_ref[...],
                            preferred_element_type=jnp.float32)

    @pl.when(s == 2 * nk - 1)
    def _():
        vf = vf_ref[...]
        b2, g2, be2 = vf[3:4], vf[4:5], vf[5:6]
        h = _layernorm(acc[...] + b2, g2, be2)
        o_ref[...] = (x_ref[...].astype(jnp.float32) + h).astype(o_ref.dtype)


# ----------------------------------------------------------------------------- wrapper
@functools.partial(jax.jit, static_argnames=("out_dtype", "tm", "d_tile",
                                              "force_weight_tiling", "mxu_dtype"))
def resblock_forward(x, params, *, out_dtype=None, tm=None, d_tile=512,
                     force_weight_tiling=False, mxu_dtype=jnp.bfloat16):
    """Fused ResBlock forward (eval mode). x: (B, S, D) — params in PyTorch layout.

    mxu_dtype: dtype fed to the MXU. Default bf16 (f32 accumulation) is an explicit
    accuracy/perf tradeoff (error grows ~sqrt(D)); pass jnp.float32 for near-exact
    parity at ~3x MXU cost. out_dtype: output dtype; jnp.bfloat16 cuts writeback HBM
    traffic ~25% in the memory-bound regime.
    """
    B, S, D = x.shape
    M = B * S
    out_dtype = x.dtype if out_dtype is None else out_dtype
    w_isz = jnp.dtype(mxu_dtype).itemsize
    budget = _vmem_budget_bytes()

    # ---- VMEM footprint models (bytes) --------------------------------------
    def fulld_bytes(tm_):
        return (2 * D * D * w_isz            # both full-D weights, single-buffered
                + 8 * D * 4                  # packed vectors
                + 2 * 2 * tm_ * D * 4        # x / out row tiles, double-buffered
                + 8 * tm_ * D * 4)           # in-kernel temporaries headroom

    def tiled_bytes(tm_, tk_):
        return (2 * 2 * D * tk_ * w_isz      # W1/W2 blocks, double-buffered
                + 2 * 8 * tk_ * 4 + 8 * D * 4
                + 2 * 2 * tm_ * D * 4        # x / out row tiles, double-buffered
                + 2 * tm_ * D * 4            # h_scr + Linear-2 accumulator scratch
                + 2 * tm_ * 128 * 4          # LN1 statistics scratch (lane-padded)
                + 6 * tm_ * tk_ * 4)         # temporaries headroom

    def pick_tk():
        for cand in (1024, 512, 256, 128):
            if cand <= min(d_tile, D) and D % cand == 0:
                return cand
        return None

    tk = pick_tk()
    use_tiled = force_weight_tiling or (fulld_bytes(256) + _SLACK > budget)
    if use_tiled and tk is None:
        if force_weight_tiling:
            raise ValueError(f"weight tiling requires D divisible by 128, got D={D}")
        use_tiled = False                    # fall back; fit check below will error
    footprint = (lambda t: tiled_bytes(t, tk)) if use_tiled else fulld_bytes

    # ---- Row-tile selection: largest MXU-aligned tile that fits VMEM --------
    if tm is not None:
        tm_eff = _round_up(max(int(tm), 8), 8)
    else:
        tm_eff = 256
        for cand in (1024, 768, 512, 256):
            if footprint(cand) + _SLACK <= budget:
                tm_eff = cand
                break
    m_unit = 256 if M >= 256 else 8
    tm_eff = max(8, min(tm_eff, _round_up(M, m_unit)))
    # Megacore (v7x: 2 TCs): keep >= 2 steps on the parallel row axis when tiles
    # can stay 256-aligned.
    if _round_up(M, tm_eff) // tm_eff < 2 and tm_eff > 256:
        tm_eff = _round_up(tm_eff // 2, 256)

    need = footprint(tm_eff) + _SLACK
    if need > budget:
        raise ValueError(
            f"ResBlock kernel needs ~{need >> 20} MiB VMEM > budget {budget >> 20} MiB "
            f"(D={D}, tm={tm_eff}, tiled={use_tiled})")
    vmem_limit = int(max(16 << 20, min(budget, footprint(tm_eff) + (4 << 20))))

    M_pad = _round_up(M, tm_eff)
    x2d = x.reshape(M, D)
    if M_pad != M:
        x2d = jnp.pad(x2d, ((0, M_pad - M), (0, 0)))

    # Weights: transpose ONCE in the wrapper to (in, out) so the kernel does a plain
    # contraction (no per-step XLU transpose of the constant weight in the kernel).
    w1t = params["w1"].T.astype(mxu_dtype)
    w2t = params["w2"].T.astype(mxu_dtype)

    # Pack the six (D,) vectors into one sublane-aligned (8, D) f32 block.
    zero = jnp.zeros((D,), jnp.float32)
    vecs = jnp.stack(
        [params["b1"].astype(jnp.float32), params["g1"].astype(jnp.float32),
         params["be1"].astype(jnp.float32), params["b2"].astype(jnp.float32),
         params["g2"].astype(jnp.float32), params["be2"].astype(jnp.float32),
         zero, zero], axis=0)

    n_rows = M_pad // tm_eff
    cost = pl.CostEstimate(
        flops=4 * M_pad * D * D,                       # two (M, D) x (D, D) matmuls
        transcendentals=2 * M_pad,                     # one rsqrt per row per LayerNorm
        bytes_accessed=(M_pad * D * 4 + M_pad * D * jnp.dtype(out_dtype).itemsize
                        + 2 * D * D * w_isz + 8 * D * 4))

    if not use_tiled:
        row_spec = pl.BlockSpec((tm_eff, D), lambda i: (i, 0))
        w_spec = pl.BlockSpec((D, D), lambda i: (0, 0), pipeline_mode=pl.Buffered(1))
        vec_spec = pl.BlockSpec((8, D), lambda i: (0, 0), pipeline_mode=pl.Buffered(1))
        kernel = functools.partial(_resblock_kernel_fulld, mxu_dtype=mxu_dtype)
        out2d = pl.pallas_call(
            kernel,
            out_shape=jax.ShapeDtypeStruct((M_pad, D), out_dtype),
            grid_spec=pltpu.PrefetchScalarGridSpec(
                num_scalar_prefetch=0, grid=(n_rows,),
                in_specs=[row_spec, w_spec, w_spec, vec_spec],
                out_specs=row_spec),
            compiler_params=pltpu.CompilerParams(
                dimension_semantics=("parallel",), vmem_limit_bytes=vmem_limit),
            cost_estimate=cost,
        )(x2d, w1t, w2t, vecs)
    else:
        nk = D // tk
        # Keep the unused weight's block index constant during the other phase so
        # Pallas does not issue dead DMAs for it.
        x_spec = pl.BlockSpec((tm_eff, D), lambda i, s: (i, 0))
        w1_spec = pl.BlockSpec((D, tk), lambda i, s: (0, jnp.minimum(s, nk - 1)))
        w2_spec = pl.BlockSpec((tk, D), lambda i, s: (jnp.maximum(s - nk, 0), 0))
        vt_spec = pl.BlockSpec((8, tk), lambda i, s: (0, s % nk))
        vf_spec = pl.BlockSpec((8, D), lambda i, s: (0, 0), pipeline_mode=pl.Buffered(1))
        out_spec = pl.BlockSpec((tm_eff, D), lambda i, s: (i, 0))
        kernel = functools.partial(_resblock_kernel_tiled, nk=nk, tk=tk, dim=D,
                                   mxu_dtype=mxu_dtype)
        out2d = pl.pallas_call(
            kernel,
            out_shape=jax.ShapeDtypeStruct((M_pad, D), out_dtype),
            grid_spec=pltpu.PrefetchScalarGridSpec(
                num_scalar_prefetch=0, grid=(n_rows, 2 * nk),
                in_specs=[x_spec, w1_spec, w2_spec, vt_spec, vf_spec],
                out_specs=out_spec,
                scratch_shapes=[
                    pltpu.VMEM((nk, tm_eff, tk), jnp.float32),   # h1 column blocks
                    pltpu.VMEM((tm_eff, D), jnp.float32),        # Linear-2 accumulator
                    pltpu.VMEM((tm_eff, 1), jnp.float32),        # LN1 sum -> mean
                    pltpu.VMEM((tm_eff, 1), jnp.float32),        # LN1 sumsq -> inv-std
                ]),
            compiler_params=pltpu.CompilerParams(
                dimension_semantics=("parallel", "arbitrary"),
                vmem_limit_bytes=vmem_limit),
            cost_estimate=cost,
        )(x2d, w1t, w2t, vecs, vecs)

    if M_pad != M:
        out2d = out2d[:M]
    return out2d.reshape(B, S, D)


# ----------------------------------------------------------------------------- helpers
def init_params(dim, key):
    """Deterministic synthetic parameters matching PyTorch ResBlock shapes."""
    k1, k2, k3, k4 = jax.random.split(key, 4)
    bound = 1.0 / (dim ** 0.5)
    return {
        "w1": jax.random.uniform(k1, (dim, dim), jnp.float32, -bound, bound),
        "b1": jax.random.uniform(k2, (dim,), jnp.float32, -bound, bound),
        "g1": jnp.ones((dim,), jnp.float32),
        "be1": jnp.zeros((dim,), jnp.float32),
        "w2": jax.random.uniform(k3, (dim, dim), jnp.float32, -bound, bound),
        "b2": jax.random.uniform(k4, (dim,), jnp.float32, -bound, bound),
        "g2": jnp.ones((dim,), jnp.float32),
        "be2": jnp.zeros((dim,), jnp.float32),
    }


def resblock_reference(x, p):
    """Pure-JAX f32 reference of the PyTorch forward (eval mode)."""
    h = x @ p["w1"].T + p["b1"]
    mean = h.mean(-1, keepdims=True)
    var = ((h - mean) ** 2).mean(-1, keepdims=True)
    h = (h - mean) / jnp.sqrt(var + LN_EPS) * p["g1"] + p["be1"]
    h = jnp.maximum(h, 0.0)
    h = h @ p["w2"].T + p["b2"]
    mean = h.mean(-1, keepdims=True)
    var = ((h - mean) ** 2).mean(-1, keepdims=True)
    h = (h - mean) / jnp.sqrt(var + LN_EPS) * p["g2"] + p["be2"]
    return x + h


if __name__ == "__main__":
    key = jax.random.PRNGKey(0)
    kx1, kp1, kx2, kp2 = jax.random.split(key, 4)

    # 1) Default path: full-D weights resident in VMEM.
    B, S, D = 2, 8, 128
    x = jax.random.normal(kx1, (B, S, D), jnp.float32)
    params = init_params(D, kp1)
    out = jax.block_until_ready(resblock_forward(x, params))
    ref = resblock_reference(x, params)
    assert out.shape == (B, S, D)
    # bf16 matmul inputs (f32 accumulation) -> relaxed tolerance vs the f32 reference.
    assert jnp.allclose(out, ref, atol=5e-2, rtol=5e-2), "full-D path mismatch"

    # 2) Weight-tiled (large-D / v7x) path, forced at a small shape to validate it.
    B2, S2, D2 = 2, 4, 256
    x2 = jax.random.normal(kx2, (B2, S2, D2), jnp.float32)
    params2 = init_params(D2, kp2)
    out2 = jax.block_until_ready(
        resblock_forward(x2, params2, force_weight_tiling=True, d_tile=128))
    ref2 = resblock_reference(x2, params2)
    assert out2.shape == (B2, S2, D2)
    assert jnp.allclose(out2, ref2, atol=5e-2, rtol=5e-2), "tiled path mismatch"

    print("KERNEL_OK")
</pallas_src>

<mosaic_0001>
module attributes {stable_mosaic.version = 11 : i64} {
  func.func @_resblock_kernel_fulld(%arg0: i32, %arg1: memref<16x128xf32, #tpu.memory_space<vmem>>, %arg2: memref<128x128xbf16, #tpu.memory_space<vmem>>, %arg3: memref<128x128xbf16, #tpu.memory_space<vmem>>, %arg4: memref<8x128xf32, #tpu.memory_space<vmem>>, %arg5: memref<16x128xf32, #tpu.memory_space<vmem>>) attributes {dimension_semantics = [#tpu.dimension_semantics<parallel>], iteration_bounds = array<i64: 1>, scalar_prefetch = 0 : i64, scratch_operands = 0 : i64, tpu.core_type = #tpu.core_type<tc>, window_params = [{transform_indices = @transform_0, window_bounds = array<i64: 16, 128>}, {pipeline_mode = #tpu.pipeline_mode<synchronous>, transform_indices = @transform_1, window_bounds = array<i64: 128, 128>}, {pipeline_mode = #tpu.pipeline_mode<synchronous>, transform_indices = @transform_2, window_bounds = array<i64: 128, 128>}, {pipeline_mode = #tpu.pipeline_mode<synchronous>, transform_indices = @transform_3, window_bounds = array<i64: 8, 128>}, {transform_indices = @transform_4, window_bounds = array<i64: 16, 128>}]} {
    %c0 = arith.constant 0 : index
    %c0_0 = arith.constant 0 : index
    %0 = vector.load %arg1[%c0, %c0_0] : memref<16x128xf32, #tpu.memory_space<vmem>>, vector<16x128xf32>
    %c0_1 = arith.constant 0 : index
    %c0_2 = arith.constant 0 : index
    %1 = vector.load %arg4[%c0_1, %c0_2] : memref<8x128xf32, #tpu.memory_space<vmem>>, vector<8x128xf32>
    %2 = vector.extract_strided_slice %1 {offsets = [0, 0], sizes = [1, 128], strides = [1, 1]} : vector<8x128xf32> to vector<1x128xf32>
    %3 = vector.extract_strided_slice %1 {offsets = [1, 0], sizes = [1, 128], strides = [1, 1]} : vector<8x128xf32> to vector<1x128xf32>
    %4 = vector.extract_strided_slice %1 {offsets = [2, 0], sizes = [1, 128], strides = [1, 1]} : vector<8x128xf32> to vector<1x128xf32>
    %5 = vector.extract_strided_slice %1 {offsets = [3, 0], sizes = [1, 128], strides = [1, 1]} : vector<8x128xf32> to vector<1x128xf32>
    %6 = vector.extract_strided_slice %1 {offsets = [4, 0], sizes = [1, 128], strides = [1, 1]} : vector<8x128xf32> to vector<1x128xf32>
    %7 = vector.extract_strided_slice %1 {offsets = [5, 0], sizes = [1, 128], strides = [1, 1]} : vector<8x128xf32> to vector<1x128xf32>
    %8 = arith.truncf %0 : vector<16x128xf32> to vector<16x128xbf16>
    %c0_3 = arith.constant 0 : index
    %c0_4 = arith.constant 0 : index
    %9 = vector.load %arg2[%c0_3, %c0_4] : memref<128x128xbf16, #tpu.memory_space<vmem>>, vector<128x128xbf16>
    %cst = arith.constant dense<0.000000e+00> : vector<16x128xf32>
    %10 = tpu.matmul %8, %9, %cst {dimension_numbers = #tpu.dot_dimension_numbers<[1], [0], [0], [1], [0, 0, 1, 1], [], []>} : vector<16x128xbf16>, vector<128x128xbf16>, vector<16x128xf32> -> vector<16x128xf32>
    %11 = vector.broadcast %2 : vector<1x128xf32> to vector<16x128xf32>
    %12 = arith.addf %10, %11 : vector<16x128xf32>
    %cst_5 = arith.constant dense<0.000000e+00> : vector<16xf32>
    %13 = vector.multi_reduction <add>, %12, %cst_5 [1] : vector<16x128xf32> to vector<16xf32>
    %14 = vector.shape_cast %13 : vector<16xf32> to vector<16x1xf32>
    %cst_6 = arith.constant 1.280000e+02 : f32
    %15 = vector.broadcast %cst_6 : f32 to vector<16x1xf32>
    %16 = arith.divf %14, %15 : vector<16x1xf32>
    %17 = vector.broadcast %16 : vector<16x1xf32> to vector<16x128xf32>
    %18 = arith.subf %12, %17 : vector<16x128xf32>
    %19 = arith.mulf %18, %18 : vector<16x128xf32>
    %cst_7 = arith.constant dense<0.000000e+00> : vector<16xf32>
    %20 = vector.multi_reduction <add>, %19, %cst_7 [1] : vector<16x128xf32> to vector<16xf32>
    %21 = vector.shape_cast %20 : vector<16xf32> to vector<16x1xf32>
    %cst_8 = arith.constant 1.280000e+02 : f32
    %22 = vector.broadcast %cst_8 : f32 to vector<16x1xf32>
    %23 = arith.divf %21, %22 : vector<16x1xf32>
    %cst_9 = arith.constant 9.99999974E-6 : f32
    %24 = vector.broadcast %cst_9 : f32 to vector<16x1xf32>
    %25 = arith.addf %23, %24 : vector<16x1xf32>
    %26 = math.rsqrt %25 : vector<16x1xf32>
    %27 = vector.broadcast %26 : vector<16x1xf32> to vector<16x128xf32>
    %28 = arith.mulf %18, %27 : vector<16x128xf32>
    %29 = vector.broadcast %3 : vector<1x128xf32> to vector<16x128xf32>
    %30 = arith.mulf %28, %29 : vector<16x128xf32>
    %31 = vector.broadcast %4 : vector<1x128xf32> to vector<16x128xf32>
    %32 = arith.addf %30, %31 : vector<16x128xf32>
    %cst_10 = arith.constant 0.000000e+00 : f32
    %33 = vector.broadcast %cst_10 : f32 to vector<16x128xf32>
    %34 = arith.maximumf %32, %33 : vector<16x128xf32>
    %35 = arith.truncf %34 : vector<16x128xf32> to vector<16x128xbf16>
    %c0_11 = arith.constant 0 : index
    %c0_12 = arith.constant 0 : index
    %36 = vector.load %arg3[%c0_11, %c0_12] : memref<128x128xbf16, #tpu.memory_space<vmem>>, vector<128x128xbf16>
    %cst_13 = arith.constant dense<0.000000e+00> : vector<16x128xf32>
    %37 = tpu.matmul %35, %36, %cst_13 {dimension_numbers = #tpu.dot_dimension_numbers<[1], [0], [0], [1], [0, 0, 1, 1], [], []>} : vector<16x128xbf16>, vector<128x128xbf16>, vector<16x128xf32> -> vector<16x128xf32>
    %38 = vector.broadcast %5 : vector<1x128xf32> to vector<16x128xf32>
    %39 = arith.addf %37, %38 : vector<16x128xf32>
    %cst_14 = arith.constant dense<0.000000e+00> : vector<16xf32>
    %40 = vector.multi_reduction <add>, %39, %cst_14 [1] : vector<16x128xf32> to vector<16xf32>
    %41 = vector.shape_cast %40 : vector<16xf32> to vector<16x1xf32>
    %cst_15 = arith.constant 1.280000e+02 : f32
    %42 = vector.broadcast %cst_15 : f32 to vector<16x1xf32>
    %43 = arith.divf %41, %42 : vector<16x1xf32>
    %44 = vector.broadcast %43 : vector<16x1xf32> to vector<16x128xf32>
    %45 = arith.subf %39, %44 : vector<16x128xf32>
    %46 = arith.mulf %45, %45 : vector<16x128xf32>
    %cst_16 = arith.constant dense<0.000000e+00> : vector<16xf32>
    %47 = vector.multi_reduction <add>, %46, %cst_16 [1] : vector<16x128xf32> to vector<16xf32>
    %48 = vector.shape_cast %47 : vector<16xf32> to vector<16x1xf32>
    %cst_17 = arith.constant 1.280000e+02 : f32
    %49 = vector.broadcast %cst_17 : f32 to vector<16x1xf32>
    %50 = arith.divf %48, %49 : vector<16x1xf32>
    %cst_18 = arith.constant 9.99999974E-6 : f32
    %51 = vector.broadcast %cst_18 : f32 to vector<16x1xf32>
    %52 = arith.addf %50, %51 : vector<16x1xf32>
    %53 = math.rsqrt %52 : vector<16x1xf32>
    %54 = vector.broadcast %53 : vector<16x1xf32> to vector<16x128xf32>
    %55 = arith.mulf %45, %54 : vector<16x128xf32>
    %56 = vector.broadcast %6 : vector<1x128xf32> to vector<16x128xf32>
    %57 = arith.mulf %55, %56 : vector<16x128xf32>
    %58 = vector.broadcast %7 : vector<1x128xf32> to vector<16x128xf32>
    %59 = arith.addf %57, %58 : vector<16x128xf32>
    %60 = arith.addf %0, %59 : vector<16x128xf32>
    %c0_19 = arith.constant 0 : index
    %c0_20 = arith.constant 0 : index
    %61 = vector.load %arg5[%c0_19, %c0_20] : memref<16x128xf32, #tpu.memory_space<vmem>>, vector<16x128xf32>
    tpu.vector_store %arg5[%c0_19, %c0_20], %60 {strides = array<i32>} : memref<16x128xf32, #tpu.memory_space<vmem>>, vector<16x128xf32>,
    return
  }
  func.func @transform_0(%arg0: i32) -> (i32, i32) {
    %c0_i32 = arith.constant 0 : i32
    %c0_i32_0 = arith.constant 0 : i32
    return %arg0, %c0_i32 : i32, i32
  }
  func.func @transform_1(%arg0: i32) -> (i32, i32) {
    %c0_i32 = arith.constant 0 : i32
    %c0_i32_0 = arith.constant 0 : i32
    %c0_i32_1 = arith.constant 0 : i32
    return %c0_i32, %c0_i32_0 : i32, i32
  }
  func.func @transform_2(%arg0: i32) -> (i32, i32) {
    %c0_i32 = arith.constant 0 : i32
    %c0_i32_0 = arith.constant 0 : i32
    %c0_i32_1 = arith.constant 0 : i32
    return %c0_i32, %c0_i32_0 : i32, i32
  }
  func.func @transform_3(%arg0: i32) -> (i32, i32) {
    %c0_i32 = arith.constant 0 : i32
    %c0_i32_0 = arith.constant 0 : i32
    %c0_i32_1 = arith.constant 0 : i32
    return %c0_i32, %c0_i32_0 : i32, i32
  }
  func.func @transform_4(%arg0: i32) -> (i32, i32) {
    %c0_i32 = arith.constant 0 : i32
    %c0_i32_0 = arith.constant 0 : i32
    return %arg0, %c0_i32 : i32, i32
  }
}

</mosaic_0001>

<bundles_post_ra>
// kernel: resblock_forward.1
= control target key start
LH: loop header
LB: loop body
LE: loop exit
PB: predicated region body
PF: predicated region fallthrough
CT: control target
= control target key end

     0   :  { %v460_v1 = vmov 0.0   ;;  %vm461_vm0 = vmmov 0   ;;  %s601_s0 = inlined_call_operand.vmem [shape: f32[16,128], index: 0, kind: input, shape index: {}]   ;;  %s602_s1 = inlined_call_operand.vmem [shape: bf16[128,128], index: 1, kind: input, shape index: {}]   ;;  %s603_s2 = inlined_call_operand.vmem [shape: bf16[128,128], index: 2, kind: input, shape index: {}]   ;;  %s604_s3 = inlined_call_operand.vmem [shape: f32[8,128], index: 3, kind: input, shape index: {}]   ;;  %s605_s4 = inlined_call_operand.hbm [shape: f32[16,128], index: 4, kind: output, shape index: {}]  }
   0x1   :  { %v412_v0 = vld [vmem:[%s602_s1] sm:$0xff]   ;;  %367 = vmatprep.subr.bf16.mxu0 %v460_v1  ;;  %387 = vmatprep.subr.bf16.mxu1 %v460_v1  ;;  %v413_v2 = vld [vmem:[%s602_s1 + $0x8] sm:$0xff]   ;;  %v414_v3 = vld [vmem:[%s602_s1 + $0x10] sm:$0xff]  }
   0x2   :  { %368 = vmatpush3.bf16.msra.mxu0 %v412_v0  ;;  %383 = vmatprep.mubr.msk.bf16.mxu0 %vm461_vm0, %v460_v1  ;;  %v415_v4 = vld [vmem:[%s602_s1 + $0x18] sm:$0xff]   ;;  %v416_v5 = vld [vmem:[%s602_s1 + $0x20] sm:$0xff]  }
   0x3   :  { %369 = vmatprep.subr.bf16.mxu0 %v460_v1  ;;  %403 = vmatprep.mubr.msk.bf16.mxu1 %vm461_vm0, %v460_v1 }
   0x6   :  { %370 = vmatpush3.bf16.msra.mxu0 %v413_v2 }
   0x7   :  { %371 = vmatprep.subr.bf16.mxu0 %v460_v1 }
   0xa   :  { %372 = vmatpush3.bf16.msra.mxu0 %v414_v3 }
   0xb   :  { %373 = vmatprep.subr.bf16.mxu0 %v460_v1 }
   0xe   :  { %374 = vmatpush3.bf16.msra.mxu0 %v415_v4 }
   0xf   :  { %9 = vsyncpa [#allocation3], 0  ;;  %375 = vmatprep.subr.bf16.mxu0 %v460_v1  ;;  %v417_v6 = vld [vmem:[%s602_s1 + $0x28] sm:$0xff]   ;;  %v418_v7 = vld [vmem:[%s602_s1 + $0x30] sm:$0xff]   ;;  %v39_v12 = vlaneseq }
  0x10   :  { %v419_v8 = vld [vmem:[%s602_s1 + $0x38] sm:$0xff]   ;;  %v527_v9 = vld [vmem:[%s601_s0] sm:$0xff]  ;;  %v532_v10 = vld [vmem:[%s601_s0 + $0x8] sm:$0xff] }
  0x11   :  { %v22_v11 = vpack.c.bf16 %v532_v10, %v527_v9  ;;  %v537_v13 = vshrl.u32 %v39_v12, 7  ;;  %v543_v15 = vld [vmem:[%s604_s3] sm:$0xff]  ;;  %v421_v32 = vld [vmem:[%s603_s2 + $0x8] sm:$0xff]   ;;  %v422_v33 = vld [vmem:[%s603_s2 + $0x10] sm:$0xff]  }
  0x12   :  { %376 = vmatpush3.bf16.msra.mxu0 %v416_v5  ;;  %v420_v23 = vld [vmem:[%s603_s2] sm:$0xff]   ;;  %v423_v34 = vld [vmem:[%s603_s2 + $0x18] sm:$0xff]   ;;  %v425_v36 = vld [vmem:[%s603_s2 + $0x28] sm:$0xff]  }
  0x13   :  { %377 = vmatprep.subr.bf16.mxu0 %v460_v1  ;;  %v41_v14 = vsub.s32 0, %v537_v13  ;;  %388 = vmatpush3.bf16.msra.mxu1 %v420_v23  ;;  %v424_v35 = vld [vmem:[%s603_s2 + $0x20] sm:$0xff]   ;;  %v426_v37 = vld [vmem:[%s603_s2 + $0x30] sm:$0xff]   ;;  %v427_v38 = vld [vmem:[%s603_s2 + $0x38] sm:$0xff]   ;;  %v157_v45 = vsub.s32 1, %v537_v13  ;;  %v163_v47 = vsub.s32 2, %v537_v13 }
  0x14   :  { %389 = vmatprep.subr.bf16.mxu1 %v460_v1  ;;  %v188_v60 = vsub.s32 3, %v537_v13  ;;  %v309_v23 = vsub.s32 5, %v537_v13  ;;  %s462_s2 = smov [#allocation2]  }
  0x15   :  { %v42_v16 = vrot.slane %v543_v15, %v41_v14  ;;  %v158_v46 = vrot.slane %v543_v15, %v157_v45  ;;  %v164_v51 = vrot.slane %v543_v15, %v163_v47  ;;  %s322_s24 = sshll.u32 %s462_s2, 4  ;;  %s323_s24 = int_to_ptr.vmem [resolvable:$true] %s322_s24 }
  0x16   :  { %378 = vmatpush3.bf16.msra.mxu0 %v417_v6  ;;  %v189_v61 = vrot.slane %v543_v15, %v188_v60  ;;  %s436_s25 = scalar_lea.vmem %s323_s24, 256  ;;  %p441_p1 = scmp.lt.s32.totalorder %s323_s24, %s323_s24 }
  0x17   :  { %379 = vmatprep.subr.bf16.mxu0 %v460_v1  ;;  %390 = vmatpush3.bf16.msra.mxu1 %v421_v32  ;;  %p437_p0 = scmp.ne.s32.totalorder %s323_s24, %s436_s25  ;;  %p442_p2 = scmp.lt.s32.totalorder %s436_s25, %s436_s25 }
  0x18   :  { %391 = vmatprep.subr.bf16.mxu1 %v460_v1 }
  0x19   :  { %p443_p3 = por %p442_p2, %p441_p1 }
  0x1a   :  { %380 = vmatpush3.bf16.msra.mxu0 %v418_v7 }
  0x1b   :  { %381 = vmatprep.subr.bf16.mxu0 %v460_v1  ;;  %392 = vmatpush3.bf16.msra.mxu1 %v422_v33  ;;  %p444_p4 = pnand %p443_p3, %p437_p0 }
  0x1c   :  { %393 = vmatprep.subr.bf16.mxu1 %v460_v1 }
  0x1e   :  { %382 = vmatpush3.bf16.msra.mxu0 %v419_v8 }
  0x1f   :  { %394 = vmatpush3.bf16.msra.mxu1 %v423_v34 }
  0x20   :  { %395 = vmatprep.subr.bf16.mxu1 %v460_v1 }
  0x21   :  { %384 = vmatmul.mubr.bf16.vlgmr.msra.gmra.mrb[0].mxu0 %v22_v11 }
  0x23   :  { %396 = vmatpush3.bf16.msra.mxu1 %v424_v35 }
  0x24   :  { %397 = vmatprep.subr.bf16.mxu1 %v460_v1 }
  0x27   :  { %398 = vmatpush3.bf16.msra.mxu1 %v425_v36 }
  0x28   :  { %399 = vmatprep.subr.bf16.mxu1 %v460_v1 }
  0x2b   :  { %400 = vmatpush3.bf16.msra.mxu1 %v426_v37 }
  0x2c   :  { %401 = vmatprep.subr.bf16.mxu1 %v460_v1 }
  0x2f   :  { %402 = vmatpush3.bf16.msra.mxu1 %v427_v38 }
  0xf4   :  { %v125_v17 = vpop.f32.mrb[0].mxu0 }
  0xf5   :  { %v126_v18 = vadd.f32 %v125_v17, %v42_v16  ;;  %v385_v19 = vpop.f32.mrb[1].mxu0 }
  0xf6   :  { %v128_v20 = vpop.f32.mrb[2].mxu0 }
  0xf7   :  { %132 = vadd.xlane.f32.xlu0 %v126_v18  ;;  %v386_v21 = vpop.f32.mrb[3].mxu0  ;;  %v129_v22 = vadd.f32 %v128_v20, %v42_v16 }
  0xfb   :  { %134 = vadd.xlane.f32.xlu0 %v129_v22 }
 0x184   :  { %v133_v24 = vpop.xlane.xlu0 %132 }
 0x185   :  { %v137_v25 = vmul.f32 0.0078125, %v133_v24 }
 0x187   :  { %v139_v26 = vsub.f32 %v126_v18, %v137_v25 }
 0x188   :  { %v135_v27 = vpop.xlane.xlu0 %134 }
 0x189   :  { %v138_v28 = vmul.f32 0.0078125, %v135_v27  ;;  %v141_v29 = vmul.f32 %v139_v26, %v139_v26  ;;  %v310_v27 = vrot.slane %v543_v15, %v309_v23 }
 0x18b   :  { %v140_v30 = vsub.f32 %v129_v22, %v138_v28  ;;  %143 = vadd.xlane.f32.xlu1 %v141_v29  ;;  %v303_v22 = vsub.s32 4, %v537_v13 }
 0x18d   :  { %v142_v31 = vmul.f32 %v140_v30, %v140_v30  ;;  %v304_v24 = vrot.slane %v543_v15, %v303_v22 }
 0x18f   :  { %145 = vadd.xlane.f32.xlu1 %v142_v31 }
 0x218   :  { %v144_v39 = vpop.xlane.xlu1 %143 }
 0x219   :  { %v147_v40 = vmul.f32 0.0078125, %v144_v39 }
 0x21b   :  { %v149_v41 = vadd.f32 1e-05, %v147_v40 }
 0x21c   :  { %v146_v42 = vpop.xlane.xlu1 %145 }
 0x21d   :  { %428 = vrsqrt.f32 %v149_v41  ;;  %v148_v43 = vmul.f32 0.0078125, %v146_v42 }
 0x21f   :  { %v150_v44 = vadd.f32 1e-05, %v148_v43 }
 0x221   :  { %430 = vrsqrt.f32 %v150_v44 }
 0x227   :  { %v429_v48 = vpop.eup %428 }
 0x228   :  { %v153_v49 = vmul.f32 %v429_v48, %v139_v26 }
 0x22a   :  { %v159_v50 = vmul.f32 %v158_v46, %v153_v49 }
 0x22b   :  { %v431_v52 = vpop.eup %430 }
 0x22c   :  { %v154_v53 = vmul.f32 %v431_v52, %v140_v30  ;;  %v165_v55 = vadd.f32 %v164_v51, %v159_v50 }
 0x22e   :  { %v160_v54 = vmul.f32 %v158_v46, %v154_v53  ;;  %v167_v57 = vmax.f32 %v165_v55, 0.0 }
 0x230   :  { %v166_v56 = vadd.f32 %v164_v51, %v160_v54 }
 0x232   :  { %v168_v58 = vmax.f32 %v166_v56, 0.0 }
 0x234   :  { %v169_v59 = vpack.c.bf16 %v168_v58, %v167_v57 }
 0x236   :  { %404 = vmatmul.mubr.bf16.vlgmr.msra.gmra.mrb[0].mxu1 %v169_v59 }
 0x309   :  { %v272_v62 = vpop.f32.mrb[0].mxu1 }
 0x30a   :  { %v273_v63 = vadd.f32 %v272_v62, %v189_v61  ;;  %v405_v0 = vpop.f32.mrb[1].mxu1 }
 0x30b   :  { %v275_v1 = vpop.f32.mrb[2].mxu1 }
 0x30c   :  { %v276_v2 = vadd.f32 %v275_v1, %v189_v61  ;;  %279 = vadd.xlane.f32.xlu0 %v273_v63  ;;  %v406_v3 = vpop.f32.mrb[3].mxu1 }
 0x30e   :  { %281 = vadd.xlane.f32.xlu1 %v276_v2 }
 0x399   :  { %v280_v4 = vpop.xlane.xlu0 %279 }
 0x39a   :  { %v283_v5 = vmul.f32 0.0078125, %v280_v4 }
 0x39b   :  { %v282_v6 = vpop.xlane.xlu1 %281 }
 0x39c   :  { %v285_v7 = vsub.f32 %v273_v63, %v283_v5  ;;  %v284_v8 = vmul.f32 0.0078125, %v282_v6 }
 0x39e   :  { %v286_v11 = vsub.f32 %v276_v2, %v284_v8  ;;  %v287_v12 = vmul.f32 %v285_v7, %v285_v7 }
 0x3a0   :  { %289 = vadd.xlane.f32.xlu0 %v287_v12  ;;  %v288_v14 = vmul.f32 %v286_v11, %v286_v11 }
 0x3a2   :  { %291 = vadd.xlane.f32.xlu1 %v288_v14 }
 0x42d   :  { %v290_v16 = vpop.xlane.xlu0 %289 }
 0x42e   :  { %v293_v17 = vmul.f32 0.0078125, %v290_v16 }
 0x42f   :  { %v292_v18 = vpop.xlane.xlu1 %291 }
 0x430   :  { %v295_v19 = vadd.f32 1e-05, %v293_v17  ;;  %v294_v20 = vmul.f32 0.0078125, %v292_v18 }
 0x432   :  { %432 = vrsqrt.f32 %v295_v19  ;;  %v296_v21 = vadd.f32 1e-05, %v294_v20 }
 0x434   :  { %434 = vrsqrt.f32 %v296_v21 }
 0x43c   :  { %v433_v25 = vpop.eup %432 }
 0x43d   :  { %v299_v26 = vmul.f32 %v433_v25, %v285_v7 }
 0x43e   :  { %v435_v28 = vpop.eup %434 }
 0x43f   :  { %v300_v29 = vmul.f32 %v435_v28, %v286_v11  ;;  %v305_v30 = vmul.f32 %v304_v24, %v299_v26 }
 0x441   :  { %v306_v31 = vmul.f32 %v304_v24, %v300_v29  ;;  %v311_v32 = vadd.f32 %v310_v27, %v305_v30 }
 0x443   :  { %v312_v33 = vadd.f32 %v310_v27, %v306_v31  ;;  %v313_v34 = vadd.f32 %v311_v32, %v527_v9 }
 0x445   :  { %v314_v35 = vadd.f32 %v312_v33, %v532_v10  ;;  %315 = vst [vmem:[#allocation2] sm:$0xff] %v313_v34 }
 0x447   :  { %316 = vst [vmem:[#allocation2 + $0x8] sm:$0xff] %v314_v35 }
 0x448   :  { %447 = shalt.err (!%p444_p4)
}
 0x449   :  { %s448_s28 = scalar_lea.hbm %s605_s4, 256 }
 0x44a   :  { %p449_p5 = scmp.ne.s32.totalorder %s605_s4, %s448_s28  ;;  %p452_p6 = scmp.lt.u32.totalorder %s448_s28, %s605_s4 }
 0x44c   :  { %p454_p7 = pnand %p452_p6, %p449_p5 }
 0x44e   :  { %457 = shalt.err (!%p454_p7)
}
 0x44f   :  { %s463_s7 = smov 128   ;;  %s464_s8 = smov 8  }
 0x450   :  { %328 = dma.vmem_to_hbm [thread:$0]  %s323_s24, 256, %s605_s4, [#allocation3], %s463_s7, %s463_s7, %s464_s8  }
 0x451   :  { %458 = dma.done.wait [#allocation3], 256  }
 0x452   :  { %459 = vsyncadd [#allocation3], 4294967040 }
 0x453   :  { %332 = vsyncpa [#allocation3], 1 }

</bundles_post_ra>
